<compile_context>
chip_gen: v7x
topology: tpu7x:2x2x1
jax: 0.10.0
libtpu: 0.0.40
codegen_flags: <defaults>
</compile_context>

<pallas_src>
import jax
import jax.numpy as jnp
from jax.experimental import pallas as pl
from jax.experimental.pallas import tpu as pltpu

EPS = 1e-5   # nn.BatchNorm1d default eps
LANE = 128   # TPU lane width


def _round_up(n, m):
    return (n + m - 1) // m * m


# ----------------------------------------------------------------------------- kernel
def make_mlp_kernel(num_hidden, activation="relu"):
    """Fused Linear->act chain.  Ref order: x, (W,b)*num_hidden, W_out, b_out, out.

    W refs are bf16 (in_pad, out_pad); b refs are f32 (1, out_pad); out is f32
    (TB, 128) lane-dense (real scalar output lives in column 0).
    """
    act = (lambda h: jnp.maximum(h, 0.0)) if activation == "relu" else jnp.tanh

    def kernel(x_ref, *refs):
        out_ref = refs[-1]
        h = x_ref[...]  # (TB, F_pad) bf16
        for li in range(num_hidden):
            w_ref, b_ref = refs[2 * li], refs[2 * li + 1]
            # MXU matmul, f32 accumulation; bias add + activation in f32 (VPU)
            h = jnp.dot(h, w_ref[...], preferred_element_type=jnp.float32) + b_ref[...]
            h = act(h).astype(jnp.bfloat16)  # next matmul operand
        wo_ref, bo_ref = refs[2 * num_hidden], refs[2 * num_hidden + 1]
        out_ref[...] = (
            jnp.dot(h, wo_ref[...], preferred_element_type=jnp.float32) + bo_ref[...]
        )

    return kernel


# ------------------------------------------------------------------- param preparation
def fold_and_pad_params(params, input_size, hidden_layers):
    """Fold eval-mode BN into Linear weights, zero-pad dims to LANE, cast W to bf16.

    Input `params` is the raw module-shaped list from init_params.
    Returns [W1,b1, W2,b2, ..., W_out,b_out] ready for the kernel.
    """
    g0, b0, m0, v0 = params[0:4]
    pending_scale = g0 * jax.lax.rsqrt(v0 + EPS)   # (1, input_size)
    pending_shift = b0 - m0 * pending_scale

    folded = []
    idx = 4
    prev = input_size
    for n in hidden_layers:
        w, b, g, be, m, v = params[idx:idx + 6]
        idx += 6
        # fold input-side affine (input BN for the first layer; identity after)
        if pending_scale is not None:
            b = b + pending_shift @ w                       # uses original W
            w = w * pending_scale.reshape(prev, 1)
            pending_scale = None
            pending_shift = None
        # fold output-side BN (eval mode)
        scale = g * jax.lax.rsqrt(v + EPS)                  # (1, n)
        shift = be - m * scale
        w = w * scale
        b = b * scale + shift
        # pad to lane-dense shapes
        prev_pad = _round_up(prev, LANE)
        n_pad = _round_up(n, LANE)
        w_p = jnp.zeros((prev_pad, n_pad), jnp.float32).at[:prev, :n].set(w)
        b_p = jnp.zeros((1, n_pad), jnp.float32).at[:, :n].set(b)
        folded += [w_p.astype(jnp.bfloat16), b_p]
        prev = n

    # output Linear(prev, 1): pad output columns to LANE so the kernel's store
    # stays lane-dense; real result is column 0.
    wo, bo = params[idx], params[idx + 1]
    prev_pad = _round_up(prev, LANE)
    wo_p = jnp.zeros((prev_pad, LANE), jnp.float32).at[:prev, :1].set(wo)
    bo_p = jnp.zeros((1, LANE), jnp.float32).at[:, :1].set(bo)
    folded += [wo_p.astype(jnp.bfloat16), bo_p]
    return folded


# ----------------------------------------------------------------------------- wrapper
def evolutive_mlp_forward(x, params, input_size, hidden_layers,
                          activation="relu", tb=128):
    B, F = x.shape
    assert F == input_size

    folded = fold_and_pad_params(params, input_size, hidden_layers)

    F_pad = _round_up(F, LANE)
    B_pad = _round_up(B, tb)
    x_p = jnp.zeros((B_pad, F_pad), jnp.float32).at[:B, :F].set(x)
    x_p = x_p.astype(jnp.bfloat16)

    num_hidden = len(hidden_layers)
    kernel = make_mlp_kernel(num_hidden, activation)

    grid = (B_pad // tb,)
    x_spec = pl.BlockSpec((tb, F_pad), lambda i: (i, 0))
    # weights/biases: full-array blocks, same block index every step -> stay resident
    param_specs = [pl.BlockSpec(p.shape, lambda i: (0, 0)) for p in folded]
    out_spec = pl.BlockSpec((tb, LANE), lambda i: (i, 0))

    out_padded = pl.pallas_call(
        kernel,
        out_shape=jax.ShapeDtypeStruct((B_pad, LANE), jnp.float32),
        grid=grid,
        in_specs=[x_spec] + param_specs,
        out_specs=out_spec,
        compiler_params=pltpu.CompilerParams(
            dimension_semantics=("parallel",)),  # batch tiles split across TCs on v7x
    )(x_p, *folded)

    return out_padded[:B, :1]


# -------------------------------------------------------------------- params & reference
def init_params(key, input_size, hidden_layers):
    """Deterministic synthetic parameters matching the PyTorch module's shapes.

    Linear weights are stored transposed: (in, out).  BN params are (1, N).
    """
    params = []

    def bn(key, n):
        k1, k2, k3, k4 = jax.random.split(key, 4)
        gamma = 1.0 + 0.1 * jax.random.normal(k1, (1, n), jnp.float32)
        beta = 0.1 * jax.random.normal(k2, (1, n), jnp.float32)
        mean = 0.1 * jax.random.normal(k3, (1, n), jnp.float32)
        var = 0.5 + jnp.abs(jax.random.normal(k4, (1, n), jnp.float32))
        return [gamma, beta, mean, var]

    keys = jax.random.split(key, 2 * len(hidden_layers) + 3)
    ki = 0

    # input BatchNorm1d(input_size)
    params += bn(keys[ki], input_size); ki += 1

    prev = input_size
    for n in hidden_layers:
        bound = 1.0 / jnp.sqrt(jnp.float32(prev))
        kw, kb = jax.random.split(keys[ki]); ki += 1
        w = jax.random.uniform(kw, (prev, n), jnp.float32, -bound, bound)  # (in, out)
        b = jax.random.uniform(kb, (1, n), jnp.float32, -bound, bound)
        params += [w, b]
        params += bn(keys[ki], n); ki += 1
        prev = n

    bound = 1.0 / jnp.sqrt(jnp.float32(prev))
    kw, kb = jax.random.split(keys[ki]); ki += 1
    wo = jax.random.uniform(kw, (prev, 1), jnp.float32, -bound, bound)
    bo = jax.random.uniform(kb, (1, 1), jnp.float32, -bound, bound)
    params += [wo, bo]
    return params


def reference_forward(x, params, hidden_layers, activation="relu"):
    """Pure-JAX f32 reference of the module's eval-mode forward (unfolded BN)."""
    act = (lambda h: jnp.maximum(h, 0.0)) if activation == "relu" else jnp.tanh
    g0, b0, m0, v0 = params[0:4]
    x = (x - m0) / jnp.sqrt(v0 + EPS) * g0 + b0
    idx = 4
    for _ in hidden_layers:
        w, b, g, be, m, v = params[idx:idx + 6]
        idx += 6
        h = x @ w + b
        h = (h - m) / jnp.sqrt(v + EPS) * g + be
        x = act(h)
    wo, bo = params[idx], params[idx + 1]
    return x @ wo + bo


# --------------------------------------------------------------------------------- main
if __name__ == "__main__":
    batch = 200            # non-multiple of the 128-row tile: exercises row padding
    input_size = 16
    hidden_layers = [32, 32]

    key = jax.random.PRNGKey(0)
    kx, kp = jax.random.split(key)
    x = jax.random.normal(kx, (batch, input_size), jnp.float32)
    params = init_params(kp, input_size, hidden_layers)

    out = evolutive_mlp_forward(x, params, input_size, hidden_layers, activation="relu")
    out = jax.block_until_ready(out)

    ref = reference_forward(x, params, hidden_layers, activation="relu")
    assert out.shape == (batch, 1)
    max_err = float(jnp.max(jnp.abs(out - ref)))
    # bf16 MXU operands + f32 accumulation: allow bf16-level tolerance vs f32 reference
    assert jnp.allclose(out, ref, atol=2e-2, rtol=2e-2), f"mismatch vs reference (max abs err {max_err})"

    print("KERNEL_OK")
</pallas_src>

<mosaic_0001>
module attributes {stable_mosaic.version = 11 : i64} {
  func.func @kernel(%arg0: i32, %arg1: memref<128x128xbf16, #tpu.memory_space<vmem>>, %arg2: memref<128x128xbf16, #tpu.memory_space<vmem>>, %arg3: memref<1x128xf32, #tpu.memory_space<vmem>>, %arg4: memref<128x128xbf16, #tpu.memory_space<vmem>>, %arg5: memref<1x128xf32, #tpu.memory_space<vmem>>, %arg6: memref<128x128xbf16, #tpu.memory_space<vmem>>, %arg7: memref<1x128xf32, #tpu.memory_space<vmem>>, %arg8: memref<128x128xf32, #tpu.memory_space<vmem>>) attributes {dimension_semantics = [#tpu.dimension_semantics<parallel>], iteration_bounds = array<i64: 2>, scalar_prefetch = 0 : i64, scratch_operands = 0 : i64, tpu.core_type = #tpu.core_type<tc>, window_params = [{transform_indices = @transform_0, window_bounds = array<i64: 128, 128>}, {pipeline_mode = #tpu.pipeline_mode<synchronous>, transform_indices = @transform_1, window_bounds = array<i64: 128, 128>}, {pipeline_mode = #tpu.pipeline_mode<synchronous>, transform_indices = @transform_2, window_bounds = array<i64: 1, 128>}, {pipeline_mode = #tpu.pipeline_mode<synchronous>, transform_indices = @transform_3, window_bounds = array<i64: 128, 128>}, {pipeline_mode = #tpu.pipeline_mode<synchronous>, transform_indices = @transform_4, window_bounds = array<i64: 1, 128>}, {pipeline_mode = #tpu.pipeline_mode<synchronous>, transform_indices = @transform_5, window_bounds = array<i64: 128, 128>}, {pipeline_mode = #tpu.pipeline_mode<synchronous>, transform_indices = @transform_6, window_bounds = array<i64: 1, 128>}, {transform_indices = @transform_7, window_bounds = array<i64: 128, 128>}]} {
    %c0 = arith.constant 0 : index
    %c0_0 = arith.constant 0 : index
    %0 = vector.load %arg1[%c0, %c0_0] : memref<128x128xbf16, #tpu.memory_space<vmem>>, vector<128x128xbf16>
    %c0_1 = arith.constant 0 : index
    %c0_2 = arith.constant 0 : index
    %1 = vector.load %arg2[%c0_1, %c0_2] : memref<128x128xbf16, #tpu.memory_space<vmem>>, vector<128x128xbf16>
    %cst = arith.constant dense<0.000000e+00> : vector<128x128xf32>
    %2 = tpu.matmul %0, %1, %cst {dimension_numbers = #tpu.dot_dimension_numbers<[1], [0], [0], [1], [0, 0, 1, 1], [], []>} : vector<128x128xbf16>, vector<128x128xbf16>, vector<128x128xf32> -> vector<128x128xf32>
    %c0_3 = arith.constant 0 : index
    %c0_4 = arith.constant 0 : index
    %3 = vector.load %arg3[%c0_3, %c0_4] : memref<1x128xf32, #tpu.memory_space<vmem>>, vector<1x128xf32>
    %4 = vector.broadcast %3 : vector<1x128xf32> to vector<128x128xf32>
    %5 = arith.addf %2, %4 : vector<128x128xf32>
    %cst_5 = arith.constant 0.000000e+00 : f32
    %6 = vector.broadcast %cst_5 : f32 to vector<128x128xf32>
    %7 = arith.maximumf %5, %6 : vector<128x128xf32>
    %8 = arith.truncf %7 : vector<128x128xf32> to vector<128x128xbf16>
    %c0_6 = arith.constant 0 : index
    %c0_7 = arith.constant 0 : index
    %9 = vector.load %arg4[%c0_6, %c0_7] : memref<128x128xbf16, #tpu.memory_space<vmem>>, vector<128x128xbf16>
    %cst_8 = arith.constant dense<0.000000e+00> : vector<128x128xf32>
    %10 = tpu.matmul %8, %9, %cst_8 {dimension_numbers = #tpu.dot_dimension_numbers<[1], [0], [0], [1], [0, 0, 1, 1], [], []>} : vector<128x128xbf16>, vector<128x128xbf16>, vector<128x128xf32> -> vector<128x128xf32>
    %c0_9 = arith.constant 0 : index
    %c0_10 = arith.constant 0 : index
    %11 = vector.load %arg5[%c0_9, %c0_10] : memref<1x128xf32, #tpu.memory_space<vmem>>, vector<1x128xf32>
    %12 = vector.broadcast %11 : vector<1x128xf32> to vector<128x128xf32>
    %13 = arith.addf %10, %12 : vector<128x128xf32>
    %cst_11 = arith.constant 0.000000e+00 : f32
    %14 = vector.broadcast %cst_11 : f32 to vector<128x128xf32>
    %15 = arith.maximumf %13, %14 : vector<128x128xf32>
    %16 = arith.truncf %15 : vector<128x128xf32> to vector<128x128xbf16>
    %c0_12 = arith.constant 0 : index
    %c0_13 = arith.constant 0 : index
    %17 = vector.load %arg6[%c0_12, %c0_13] : memref<128x128xbf16, #tpu.memory_space<vmem>>, vector<128x128xbf16>
    %cst_14 = arith.constant dense<0.000000e+00> : vector<128x128xf32>
    %18 = tpu.matmul %16, %17, %cst_14 {dimension_numbers = #tpu.dot_dimension_numbers<[1], [0], [0], [1], [0, 0, 1, 1], [], []>} : vector<128x128xbf16>, vector<128x128xbf16>, vector<128x128xf32> -> vector<128x128xf32>
    %c0_15 = arith.constant 0 : index
    %c0_16 = arith.constant 0 : index
    %19 = vector.load %arg7[%c0_15, %c0_16] : memref<1x128xf32, #tpu.memory_space<vmem>>, vector<1x128xf32>
    %20 = vector.broadcast %19 : vector<1x128xf32> to vector<128x128xf32>
    %21 = arith.addf %18, %20 : vector<128x128xf32>
    %c0_17 = arith.constant 0 : index
    %c0_18 = arith.constant 0 : index
    %22 = vector.load %arg8[%c0_17, %c0_18] : memref<128x128xf32, #tpu.memory_space<vmem>>, vector<128x128xf32>
    tpu.vector_store %arg8[%c0_17, %c0_18], %21 {strides = array<i32>} : memref<128x128xf32, #tpu.memory_space<vmem>>, vector<128x128xf32>,
    return
  }
  func.func @transform_0(%arg0: i32) -> (i32, i32) {
    %c0_i32 = arith.constant 0 : i32
    %c0_i32_0 = arith.constant 0 : i32
    return %arg0, %c0_i32 : i32, i32
  }
  func.func @transform_1(%arg0: i32) -> (i32, i32) {
    %c0_i32 = arith.constant 0 : i32
    %c0_i32_0 = arith.constant 0 : i32
    %c0_i32_1 = arith.constant 0 : i32
    return %c0_i32, %c0_i32_0 : i32, i32
  }
  func.func @transform_2(%arg0: i32) -> (i32, i32) {
    %c0_i32 = arith.constant 0 : i32
    %c0_i32_0 = arith.constant 0 : i32
    %c0_i32_1 = arith.constant 0 : i32
    return %c0_i32, %c0_i32_0 : i32, i32
  }
  func.func @transform_3(%arg0: i32) -> (i32, i32) {
    %c0_i32 = arith.constant 0 : i32
    %c0_i32_0 = arith.constant 0 : i32
    %c0_i32_1 = arith.constant 0 : i32
    return %c0_i32, %c0_i32_0 : i32, i32
  }
  func.func @transform_4(%arg0: i32) -> (i32, i32) {
    %c0_i32 = arith.constant 0 : i32
    %c0_i32_0 = arith.constant 0 : i32
    %c0_i32_1 = arith.constant 0 : i32
    return %c0_i32, %c0_i32_0 : i32, i32
  }
  func.func @transform_5(%arg0: i32) -> (i32, i32) {
    %c0_i32 = arith.constant 0 : i32
    %c0_i32_0 = arith.constant 0 : i32
    %c0_i32_1 = arith.constant 0 : i32
    return %c0_i32, %c0_i32_0 : i32, i32
  }
  func.func @transform_6(%arg0: i32) -> (i32, i32) {
    %c0_i32 = arith.constant 0 : i32
    %c0_i32_0 = arith.constant 0 : i32
    %c0_i32_1 = arith.constant 0 : i32
    return %c0_i32, %c0_i32_0 : i32, i32
  }
  func.func @transform_7(%arg0: i32) -> (i32, i32) {
    %c0_i32 = arith.constant 0 : i32
    %c0_i32_0 = arith.constant 0 : i32
    return %arg0, %c0_i32 : i32, i32
  }
}

</mosaic_0001>

<bundles_post_ra>
// kernel: tpu_custom_call.1
= control target key start
LH: loop header
LB: loop body
LE: loop exit
PB: predicated region body
PF: predicated region fallthrough
CT: control target
= control target key end

     0   :  { %12 = vsyncpa [#allocation3], 0  ;;  %s2007_s0 = inlined_call_operand.hbm [shape: bf16[256,128], index: 0, kind: input, shape index: {}]   ;;  %s2008_s1 = inlined_call_operand.hbm [shape: bf16[128,128], index: 1, kind: input, shape index: {}]   ;;  %s2009_s2 = inlined_call_operand.vmem [shape: f32[1,128], index: 2, kind: input, shape index: {}]   ;;  %s2010_s3 = inlined_call_operand.hbm [shape: bf16[128,128], index: 3, kind: input, shape index: {}]   ;;  %s2011_s4 = inlined_call_operand.vmem [shape: f32[1,128], index: 4, kind: input, shape index: {}]   ;;  %s2012_s5 = inlined_call_operand.hbm [shape: bf16[128,128], index: 5, kind: input, shape index: {}]   ;;  %s2013_s6 = inlined_call_operand.vmem [shape: f32[1,128], index: 6, kind: input, shape index: {}]   ;;  %s2014_s7 = inlined_call_operand.hbm [shape: f32[256,128], index: 7, kind: output, shape index: {}]  }
   0x1   :  { %14 = vsyncpa [#allocation3 + $0x1], 0 }
   0x2   :  { %15 = vsyncpa [#allocation6], 0 }
   0x3   :  { %16 = vsyncpa [#allocation9], 0 }
   0x4   :  { %17 = vsyncpa [#allocation4], 0 }
   0x5   :  { %19 = vsyncpa [#allocation4 + $0x1], 0  ;;  %s1661_s24 = smov 0   ;;  %s1663_s25 = smov 0  }
   0x6   :  { %s1665_s26 = smov 0   ;;  %s1667_s27 = smov 0  }
   0x7 LB: > { %s1682_s28 = sadd.s32 4294967295, %s1610_s27   ;;  %s1092_s29 = sadd.s32 4294967294, %s1610_s27   ;;  %s1610_s27 = sphi %s1667_s27, %s2040_s27   ;;  %s1606_s26 = sphi %s1665_s26, %s2039_s26   ;;  %s1602_s25 = sphi %s1663_s25, %s2038_s25   ;;  %s1598_s24 = sphi %s1661_s24, %s2037_s24  }
   0x8   : > { %p45_p0 = scmp.ne.s32.totalorder %s1602_s25, %s1598_s24  ;;  %p2015_p1 = scmp.eq.s32.totalorder %s1682_s28, 0 }
   0x9   : > { %p201_p3 = scmp.eq.s32.totalorder %s1092_s29, 1  ;;  %p1093_p5 = scmp.ge.s32.totalorder %s1610_s27, 1 }
   0xa   : > { %p1691_p4 = por %p2015_p1, %p45_p0  ;;  %p208_p7 = scmp.lt.s32.totalorder %s1610_s27, 3 }
   0xb   : > { %p1696_p6 = por %p201_p3, %p45_p0  ;;  %s1612_s10 = smov [#allocation5]  }
   0xc   : > { %s2019_s30 = scalar_select %p1691_p4, 1, 0 }
   0xd   : > { %s2020_s8 = scalar_select %p1696_p6, 1, 0 }
   0xe   : > { %p1701_p8 = pnand %p1093_p5, %p208_p7  ;;  %s220_s11 = sshll.u32 %s1612_s10, 4  ;;  %s1705_s11 = int_to_ptr.vmem [resolvable:$true] %s220_s11 }
   0xf   : > { %2021 = sst [smem:[#allocation15_spill]] %s2020_s8  ;;  %s1613_s13 = smov [#allocation7]  }
  0x10   : > { %s2022_s9 = scalar_select %p1701_p8, 1, 0 }
  0x11   : > { %p1325_p9 = pneg %p1701_p8  ;;  %s236_s14 = sshll.u32 %s1613_s13, 4  ;;  %s1716_s14 = int_to_ptr.vmem [resolvable:$true] %s236_s14 }
  0x12   : > { %s1614_s15 = smov [#allocation8]   ;;  %s1422_s19 = scalar_lea.hbm %s2008_s1, 1024 }
  0x13   : > { %p1712_p11 = pnand %p1325_p9, %p2015_p1  ;;  %s1718_s16 = sshll.u32 %s1614_s15, 4  ;;  %s253_s16 = int_to_ptr.vmem [resolvable:$true] %s1718_s16 }
  0x14   : > { %p1423_p12 = scmp.ne.s32.totalorder %s2008_s1, %s1422_s19  ;;  %p1429_p5 = scmp.lt.u32.totalorder %s1422_s19, %s2008_s1 }
  0x15   : > { %p1728_p13 = pneg %p1712_p11 }
  0x17   : > { %p1425_p0 = pnand %p1728_p13, %p1423_p12 }
  0x19   : > { %p1426_p3 = pneg %p1425_p0 }
  0x1b   : > { %p1431_p7 = pnand %p1429_p5, %p1426_p3 }
  0x1d   : > { %1434 = shalt.err (!%p1431_p7)
}
  0x1e   : > { %s1435_s10 = scalar_lea.vmem %s1705_s11, 1024  ;;  %p1443_p2 = scmp.lt.s32.totalorder %s1705_s11, %s1705_s11 }
  0x1f   : > { %p1436_p9 = scmp.ne.s32.totalorder %s1705_s11, %s1435_s10  ;;  %p1444_p6 = scmp.lt.s32.totalorder %s1435_s10, %s1435_s10 }
  0x21   : > { %p1438_p10 = pnand %p1436_p9, %p1728_p13  ;;  %p1445_p12 = por %p1444_p6, %p1443_p2 }
  0x23   : > { %p1439_p1 = pneg %p1438_p10 }
  0x25   : > { %p1446_p0 = pnand %p1445_p12, %p1439_p1 }
  0x27   : > { %1449 = shalt.err (!%p1446_p0)
}
  0x28   : > { %s1615_s13 = smov 64   ;;  %s1616_s15 = smov 4  }
  0x29   : > { %1328 = dma.hbm_to_vmem [thread:$0]  (!%p1712_p11), %s2008_s1, 1024, %s1705_s11, [#allocation6], %s1615_s13, %s1615_s13, %s1616_s15  }
  0x2a   : > { %s1450_s21 = scalar_lea.hbm %s2010_s3, 1024 }
  0x2b   : > { %p1451_p1 = scmp.ne.s32.totalorder %s2010_s3, %s1450_s21  ;;  %p1457_p10 = scmp.lt.u32.totalorder %s1450_s21, %s2010_s3 }
  0x2d   : > { %p1453_p2 = pnand %p1451_p1, %p1728_p13 }
  0x2f   : > { %p1454_p6 = pneg %p1453_p2 }
  0x31   : > { %p1459_p3 = pnand %p1457_p10, %p1454_p6 }
  0x33   : > { %1462 = shalt.err (!%p1459_p3)
}
  0x34   : > { %s1463_s11 = scalar_lea.vmem %s1716_s14, 1024  ;;  %p1471_p12 = scmp.lt.s32.totalorder %s1716_s14, %s1716_s14 }
  0x35   : > { %p1464_p5 = scmp.ne.s32.totalorder %s1716_s14, %s1463_s11  ;;  %p1472_p0 = scmp.lt.s32.totalorder %s1463_s11, %s1463_s11 }
  0x37   : > { %p1466_p7 = pnand %p1464_p5, %p1728_p13  ;;  %p1473_p1 = por %p1472_p0, %p1471_p12 }
  0x39   : > { %p1467_p9 = pneg %p1466_p7 }
  0x3b   : > { %p1474_p2 = pnand %p1473_p1, %p1467_p9 }
  0x3d   : > { %1477 = shalt.err (!%p1474_p2)
}
  0x3e   : > { %1331 = dma.hbm_to_vmem [thread:$0]  (!%p1712_p11), %s2010_s3, 1024, %s1716_s14, [#allocation6], %s1615_s13, %s1615_s13, %s1616_s15  }
  0x3f   : > { %s1478_s20 = scalar_lea.hbm %s2012_s5, 1024 }
  0x40   : > { %p1479_p6 = scmp.ne.s32.totalorder %s2012_s5, %s1478_s20  ;;  %p1485_p5 = scmp.lt.u32.totalorder %s1478_s20, %s2012_s5 }
  0x42   : > { %p1481_p10 = pnand %p1479_p6, %p1728_p13 }
  0x44   : > { %p1482_p3 = pneg %p1481_p10 }
  0x46   : > { %p1487_p7 = pnand %p1485_p5, %p1482_p3 }
  0x48   : > { %1490 = shalt.err (!%p1487_p7)
}
  0x49   : > { %s1491_s11 = scalar_lea.vmem %s253_s16, 1024  ;;  %p1499_p1 = scmp.lt.s32.totalorder %s253_s16, %s253_s16 }
  0x4a   : > { %p1492_p9 = scmp.ne.s32.totalorder %s253_s16, %s1491_s11  ;;  %p1500_p2 = scmp.lt.s32.totalorder %s1491_s11, %s1491_s11 }
  0x4c   : > { %p1494_p12 = pnand %p1492_p9, %p1728_p13  ;;  %p1501_p4 = por %p1500_p2, %p1499_p1 }
  0x4e   : > { %p1495_p0 = pneg %p1494_p12 }
  0x50   : > { %p1502_p8 = pnand %p1501_p4, %p1495_p0 }
  0x52   : > { %1505 = shalt.err (!%p1502_p8)
}
  0x53   : > { %1334 = dma.hbm_to_vmem [thread:$0]  (!%p1712_p11), %s2012_s5, 1024, %s253_s16, [#allocation9], %s1615_s13, %s1615_s13, %s1616_s15  }
  0x54   : > { %s1801_s22 = sadd.s32 1, %s1610_s27   ;;  %s32_s17 = sadd.s32 1, %s1606_s26 }
  0x55   : > { %s29_s12 = ssub.s32 %s1610_s27, %s1801_s22  ;;  %p39_p8 = scmp.ne.s32.totalorder %s1606_s26, %s1602_s25 }
  0x56   : > { %p30_p4 = scmp.eq.s32.totalorder %s29_s12, 0  ;;  %p40_p13 = scmp.eq.s32.totalorder %s1610_s27, 0 }
  0x57   : > { %p1346_p6 = scmp.lt.s32.totalorder %s1610_s27, 2  ;;  %p2025_p3 = scmp.eq.s32.totalorder %s1682_s28, 1 }
  0x58   : > { %s1811_s18 = scalar_select %p30_p4, %s1606_s26, %s32_s17  }
  0x59   : > { %p41_p10 = por %p40_p13, %p39_p8  ;;  %p1815_p5 = por %p2025_p3, %p39_p8 }
  0x5a   : > { %s269_s20 = sand.u32 1, %s1606_s26   ;;  %s1147_s21 = sshll.u32 %s1610_s27, 10 }
  0x5b   : > { %s1098_s16 = sshll.u32 %s269_s20, 6  ;;  %s1824_s10 = scalar_lea.hbm %s2007_s0, %s1147_s21 }
  0x5c   : > { %s273_s11 = scalar_lea.vmem [#allocation2], %s1098_s16  ;;  %p1826_p11 = pnand %p1346_p6, %p41_p10 }
  0x5d   : > { %s280_s14 = sshll.u32 %s273_s11, 4  ;;  %s1832_s12 = scalar_lea.sflag [#allocation3], %s269_s20  ;;  %s1830_s14 = int_to_ptr.vmem [resolvable:$true] %s280_s14 }
  0x5e   : > { %s1506_s17 = scalar_lea.hbm %s1824_s10, 1024  ;;  %p1508_p9 = pneg %p1826_p11 }
  0x5f   : > { %p1507_p7 = scmp.ne.s32.totalorder %s1824_s10, %s1506_s17  ;;  %s1511_s23 = scalar_lea.hbm %s2007_s0, 2048 }
  0x60   : > { %p1512_p1 = scmp.lt.u32.totalorder %s1824_s10, %s2007_s0  ;;  %p1513_p2 = scmp.lt.u32.totalorder %s1511_s23, %s1506_s17 }
  0x61   : > { %p1509_p12 = pnand %p1508_p9, %p1507_p7  ;;  %p1515_p8 = scmp.lt.u32.totalorder %s1506_s17, %s1824_s10 }
  0x62   : > { %p1514_p4 = por %p1513_p2, %p1512_p1 }
  0x63   : > { %p1510_p0 = pneg %p1509_p12 }
  0x64   : > { %p1516_p13 = por %p1515_p8, %p1514_p4 }
  0x66   : > { %p1517_p6 = pnand %p1516_p13, %p1510_p0 }
  0x68   : > { %1520 = shalt.err (!%p1517_p6)
}
  0x69   : > { %s1521_s20 = scalar_lea.vmem %s1830_s14, 1024  ;;  %s1617_s21 = smov [#allocation2]  }
  0x6a   : > { %p1522_p10 = scmp.ne.s32.totalorder %s1830_s14, %s1521_s20  ;;  %s1526_s16 = sshll.u32 %s1617_s21, 4  ;;  %s1527_s16 = int_to_ptr.vmem [resolvable:$false] %s1526_s16 }
  0x6b   : > { %s1528_s29 = scalar_lea.vmem %s1527_s16, 2048  ;;  %p1529_p12 = scmp.lt.s32.totalorder %s1830_s14, %s1527_s16 }
  0x6c   : > { %p1524_p3 = pnand %p1522_p10, %p1508_p9  ;;  %p1530_p1 = scmp.lt.s32.totalorder %s1528_s29, %s1521_s20 }
  0x6e   : > { %p1525_p7 = pneg %p1524_p3  ;;  %p1531_p2 = por %p1530_p1, %p1529_p12 }
  0x70   : > { %p1532_p4 = pnand %p1531_p2, %p1525_p7 }
  0x72   : > { %1535 = shalt.err (!%p1532_p4)
}
  0x73   : > { %1338 = dma.hbm_to_vmem [thread:$0]  (!%p1826_p11), %s1824_s10, 1024, %s1830_s14, %s1832_s12, %s1615_s13, %s1615_s13, %s1616_s15  }
  0x74   : > { %p2028_p9 = scmp.ne.s32.totalorder %s2022_s9, 0 }
  0x75   : > { %s1866_s17 = sand.u32 (!%p2028_p9), 1, %s1602_s25   ;;  %p2029_p0 = scmp.ne.s32.totalorder (!%p2028_p9), %s2019_s30, 0 }
  0x76   : > { %292 = sbr.rel (%p2028_p9) target bundleno = 866 (0x362), region = 48  ;;  %s1102_s23 = sshll.u32 (!%p2028_p9), %s1866_s17, 6 }
  0x77   : > { %s295_s11 = scalar_lea.sflag (!%p2028_p9), [#allocation3], %s1866_s17  ;;  %s1870_s20 = scalar_lea.vmem (!%p2028_p9), [#allocation2], %s1102_s23 }
  0x7d   : > { %1581 = dma.done.wait (%p2029_p0), %s295_s11, 1024  }
  0x7e   : > { %1583 = vsyncadd (%p2029_p0), %s295_s11, 4294966272  ;;  %p2030_p11 = scmp.eq.s32.totalorder %s1682_s28, 0 }
  0x80   : > { %1585 = dma.done.wait (%p2030_p11), [#allocation6], 2048   ;;  %p2031_p8 = pmov %p2030_p11 }
  0x82   : > { %1587 = vsyncadd (%p2031_p8), [#allocation6], 4294965248  ;;  %p2032_p13 = pmov %p2031_p8 }
  0x83   : > { %p2033_p6 = pmov %p2031_p8 }
  0x84   : > { %1589 = dma.done.wait (%p2032_p13), [#allocation9], 1024  }
  0x85   : > { %1591 = vsyncadd (%p2033_p6), [#allocation9], 4294966272  ;;  %v1390_v0 = vld [vmem:[#allocation5] sm:$0xff]   ;;  %v1391_v1 = vld [vmem:[#allocation5 + $0x8] sm:$0xff]   ;;  %s1106_s10 = sshll.u32 %s1866_s17, 7  ;;  %s1148_s21 = sshll.u32 %s1682_s28, 11 }
  0x86   : > { %1197 = vmatprep.subr.bf16.mxu0 %v1390_v0  ;;  %v1392_v2 = vld [vmem:[#allocation5 + $0x10] sm:$0xff]   ;;  %v1393_v3 = vld [vmem:[#allocation5 + $0x18] sm:$0xff]   ;;  %v1398_v4 = vld [vmem:[%s1870_s20] sm:$0xff]   ;;  %s1938_s12 = scalar_lea.vmem [#allocation10], %s1106_s10  ;;  %s1958_s11 = scalar_lea.hbm %s2014_s7, %s1148_s21 }
  0x87   : > { %1198 = vmatpush3.bf16.msra.mxu0 %v1390_v0  ;;  %1213 = vmatprep.mubr.bf16.mxu0 %v1398_v4  ;;  %v1394_v5 = vld [vmem:[#allocation5 + $0x20] sm:$0xff]   ;;  %v1395_v6 = vld [vmem:[#allocation5 + $0x28] sm:$0xff]   ;;  %v1396_v9 = vld [vmem:[#allocation5 + $0x30] sm:$0xff]   ;;  %s990_s16 = sshll.u32 %s1938_s12, 4  ;;  %s977_s28 = scalar_lea.sflag [#allocation4], %s1866_s17  ;;  %s1960_s16 = int_to_ptr.vmem [resolvable:$true] %s990_s16 }
  0x88   : > { %1199 = vmatprep.subr.bf16.mxu0 %v1391_v1  ;;  %v1406_v7 = vld [vmem:[#allocation7] sm:$0xff]   ;;  %v1407_v8 = vld [vmem:[#allocation7 + $0x8] sm:$0xff]   ;;  %v1408_v10 = vld [vmem:[#allocation7 + $0x10] sm:$0xff]   ;;  %s1618_s30 = smov [#allocation10]  }
  0x89   : > { %1229 = vmatprep.subr.bf16.mxu1 %v1406_v7  ;;  %v1397_v11 = vld [vmem:[#allocation5 + $0x38] sm:$0xff]   ;;  %v1410_v13 = vld [vmem:[#allocation7 + $0x20] sm:$0xff]   ;;  %v1399_v14 = vld [vmem:[%s1870_s20 + $0x8] sm:$0xff]   ;;  %s1540_s9 = sshll.u32 %s1618_s30, 4  ;;  %s1541_s9 = int_to_ptr.vmem [resolvable:$false] %s1540_s9 }
  0x8a   : > { %1230 = vmatpush3.bf16.msra.mxu1 %v1406_v7  ;;  %v1409_v12 = vld [vmem:[#allocation7 + $0x18] sm:$0xff]   ;;  %v1400_v15 = vld [vmem:[%s1870_s20 + $0x10] sm:$0xff]   ;;  %v1411_v16 = vld [vmem:[#allocation7 + $0x28] sm:$0xff]   ;;  %s1542_s13 = scalar_lea.vmem %s1541_s9, 4096  ;;  %p1543_p12 = scmp.lt.s32.totalorder %s1960_s16, %s1541_s9 }
  0x8b   : > { %1200 = vmatpush3.bf16.msra.mxu0 %v1391_v1  ;;  %1231 = vmatprep.subr.bf16.mxu1 %v1407_v8  ;;  %v1401_v17 = vld [vmem:[%s1870_s20 + $0x18] sm:$0xff]   ;;  %v1402_v18 = vld [vmem:[%s1870_s20 + $0x20] sm:$0xff]   ;;  %v1403_v19 = vld [vmem:[%s1870_s20 + $0x28] sm:$0xff]  }
  0x8c   : > { %1201 = vmatprep.subr.bf16.mxu0 %v1392_v2  ;;  %v1404_v20 = vld [vmem:[%s1870_s20 + $0x30] sm:$0xff]   ;;  %v1405_v21 = vld [vmem:[%s1870_s20 + $0x38] sm:$0xff]   ;;  %v1414_v24 = vld [vmem:[#allocation8] sm:$0xff]   ;;  %s1536_s20 = scalar_lea.vmem %s1960_s16, 2048 }
  0x8d   : > { %v1412_v22 = vld [vmem:[#allocation7 + $0x30] sm:$0xff]   ;;  %v1413_v23 = vld [vmem:[#allocation7 + $0x38] sm:$0xff]   ;;  %v1415_v25 = vld [vmem:[#allocation8 + $0x8] sm:$0xff]   ;;  %p1537_p10 = scmp.ne.s32.totalorder %s1960_s16, %s1536_s20  ;;  %p1544_p1 = scmp.lt.s32.totalorder %s1542_s13, %s1536_s20 }
  0x8e   : > { %1232 = vmatpush3.bf16.msra.mxu1 %v1407_v8  ;;  %v1416_v26 = vld [vmem:[#allocation8 + $0x10] sm:$0xff]   ;;  %v1892_v27 = vld [vmem:[#allocation8 + $0x18] sm:$0xff]   ;;  %v1895_v28 = vld [vmem:[#allocation8 + $0x20] sm:$0xff]  }
  0x8f   : > { %1202 = vmatpush3.bf16.msra.mxu0 %v1392_v2  ;;  %1233 = vmatprep.subr.bf16.mxu1 %v1408_v10  ;;  %v1899_v29 = vld [vmem:[#allocation8 + $0x28] sm:$0xff]   ;;  %v1907_v30 = vld [vmem:[%s2009_s2] ss:$0 sm:$0xff]  ;;  %p1538_p3 = pnand %p1537_p10, %p1815_p5  ;;  %p1545_p2 = por %p1544_p1, %p1543_p12 }
  0x90   : > { %1203 = vmatprep.subr.bf16.mxu0 %v1393_v3 }
  0x91   : > { %p1539_p7 = pneg %p1538_p3 }
  0x92   : > { %1234 = vmatpush3.bf16.msra.mxu1 %v1408_v10 }
  0x93   : > { %1204 = vmatpush3.bf16.msra.mxu0 %v1393_v3  ;;  %1235 = vmatprep.subr.bf16.mxu1 %v1409_v12  ;;  %p1546_p4 = pnand %p1545_p2, %p1539_p7 }
  0x94   : > { %1205 = vmatprep.subr.bf16.mxu0 %v1394_v5 }
  0x96   : > { %1236 = vmatpush3.bf16.msra.mxu1 %v1409_v12 }
  0x97   : > { %1206 = vmatpush3.bf16.msra.mxu0 %v1394_v5  ;;  %1237 = vmatprep.subr.bf16.mxu1 %v1410_v13 }
  0x98   : > { %1207 = vmatprep.subr.bf16.mxu0 %v1395_v6 }
  0x9a   : > { %1238 = vmatpush3.bf16.msra.mxu1 %v1410_v13 }
  0x9b   : > { %1208 = vmatpush3.bf16.msra.mxu0 %v1395_v6  ;;  %1239 = vmatprep.subr.bf16.mxu1 %v1411_v16 }
  0x9c   : > { %1209 = vmatprep.subr.bf16.mxu0 %v1396_v9 }
  0x9e   : > { %1240 = vmatpush3.bf16.msra.mxu1 %v1411_v16 }
  0x9f   : > { %1210 = vmatpush3.bf16.msra.mxu0 %v1396_v9  ;;  %1241 = vmatprep.subr.bf16.mxu1 %v1412_v22 }
  0xa0   : > { %1211 = vmatprep.subr.bf16.mxu0 %v1397_v11 }
  0xa2   : > { %1242 = vmatpush3.bf16.msra.mxu1 %v1412_v22 }
  0xa3   : > { %1212 = vmatpush3.bf16.msra.mxu0 %v1397_v11  ;;  %1243 = vmatprep.subr.bf16.mxu1 %v1413_v23 }
  0xa4   : > { %1261 = vmatprep.subr.bf16.mxu0 %v1414_v24 }
  0xa6   : > { %1214 = vmatmul.mubr.bf16.vlgmr.msra.gmra.mrb[0].mxu0 %v1399_v14  ;;  %1244 = vmatpush3.bf16.msra.mxu1 %v1413_v23  ;;  %v1420_v23 = vld [vmem:[#allocation8 + $0x30] sm:$0xff]  }
  0xa7   : > { %1217 = vmatprep.mubr.bf16.mxu0 %v1400_v15  ;;  %1293 = vmatprep.subr.bf16.mxu1 %v1414_v24 }
  0xa8   : > { %1262 = vmatpush3.bf16.msra.mxu0 %v1414_v24 }
  0xa9   : > { %1263 = vmatprep.subr.bf16.mxu0 %v1415_v25 }
  0xac   : > { %1264 = vmatpush3.bf16.msra.mxu0 %v1415_v25 }
  0xad   : > { %1265 = vmatprep.subr.bf16.mxu0 %v1416_v26 }
  0xae   : > { %1218 = vmatmul.mubr.bf16.gmra.mrb[4].mxu0 %v1401_v17 }
  0xaf   : > { %1221 = vmatprep.mubr.bf16.mxu0 %v1402_v18 }
  0xb0   : > { %1266 = vmatpush3.bf16.msra.mxu0 %v1416_v26 }
  0xb1   : > { %1267 = vmatprep.subr.bf16.mxu0 %v1892_v27 }
  0xb4   : > { %1268 = vmatpush3.bf16.msra.mxu0 %v1892_v27 }
  0xb5   : > { %1269 = vmatprep.subr.bf16.mxu0 %v1895_v28 }
  0xb6   : > { %1222 = vmatmul.mubr.bf16.gmra.mrb[8].mxu0 %v1403_v19 }
  0xb7   : > { %1225 = vmatprep.mubr.bf16.mxu0 %v1404_v20 }
  0xb8   : > { %1270 = vmatpush3.bf16.msra.mxu0 %v1895_v28 }
  0xb9   : > { %1271 = vmatprep.subr.bf16.mxu0 %v1899_v29 }
  0xbc   : > { %1272 = vmatpush3.bf16.msra.mxu0 %v1899_v29 }
  0xbd   : > { %1273 = vmatprep.subr.bf16.mxu0 %v1420_v23 }
  0xbe   : > { %1226 = vmatmul.mubr.bf16.gmra.mrb[12].mxu0 %v1405_v21 }
  0xc0   : > { %1274 = vmatpush3.bf16.msra.mxu0 %v1420_v23 }
 0x179   : > { %v1215_v31 = vpop.f32.mrb[0].mxu0 }
 0x17a   : > { %v522_v32 = vadd.f32 %v1215_v31, %v1907_v30  ;;  %v513_v33 = vpop.f32.mrb[1].mxu0 }
 0x17b   : > { %v514_v34 = vadd.f32 %v1907_v30, %v513_v33  ;;  %v1216_v35 = vpop.f32.mrb[2].mxu0 }
 0x17c   : > { %v525_v36 = vadd.f32 %v1216_v35, %v1907_v30  ;;  %v516_v37 = vpop.f32.mrb[3].mxu0  ;;  %v578_v39 = vmax.f32 %v522_v32, 0.0 }
 0x17d   : > { %v517_v38 = vadd.f32 %v1907_v30, %v516_v37  ;;  %v576_v41 = vmax.f32 %v514_v34, 0.0 }
 0x17e   : > { %v579_v40 = vmax.f32 %v525_v36, 0.0 }
 0x17f   : > { %v577_v42 = vmax.f32 %v517_v38, 0.0 }
 0x180   : > { %v593_v43 = vpack.c.bf16 %v579_v40, %v578_v39 }
 0x181   : > { %v1219_v44 = vpop.f32.mrb[4].mxu0  ;;  %v592_v45 = vpack.c.bf16 %v577_v42, %v576_v41 }
 0x182   : > { %v538_v46 = vadd.f32 %v1219_v44, %v1907_v30  ;;  %v529_v47 = vpop.f32.mrb[5].mxu0 }
 0x183   : > { %v530_v48 = vadd.f32 %v1907_v30, %v529_v47  ;;  %v1220_v49 = vpop.f32.mrb[6].mxu0  ;;  %1245 = vmatprep.mubr.bf16.mxu1 %v592_v45 }
 0x184   : > { %v541_v50 = vadd.f32 %v1220_v49, %v1907_v30  ;;  %v532_v51 = vpop.f32.mrb[7].mxu0  ;;  %1246 = vmatmul.mubr.bf16.vlgmr.msra.gmra.mrb[0].mxu1 %v593_v43  ;;  %v582_v53 = vmax.f32 %v538_v46, 0.0 }
 0x185   : > { %v533_v52 = vadd.f32 %v1907_v30, %v532_v51  ;;  %1301 = vmatpush3.bf16.msra.mxu1 %v1414_v24  ;;  %v580_v55 = vmax.f32 %v530_v48, 0.0  ;;  %v1421_v24 = vld [vmem:[#allocation8 + $0x38] sm:$0xff]  }
 0x186   : > { %v583_v54 = vmax.f32 %v541_v50, 0.0  ;;  %1294 = vmatprep.subr.bf16.mxu1 %v1415_v25  ;;  %1275 = vmatprep.subr.bf16.mxu0 %v1421_v24 }
 0x187   : > { %v581_v56 = vmax.f32 %v533_v52, 0.0  ;;  %1276 = vmatpush3.bf16.msra.mxu0 %v1421_v24 }
 0x188   : > { %v595_v57 = vpack.c.bf16 %v583_v54, %v582_v53 }
 0x189   : > { %v594_v58 = vpack.c.bf16 %v581_v56, %v580_v55  ;;  %v1223_v59 = vpop.f32.mrb[8].mxu0  ;;  %1302 = vmatpush3.bf16.msra.mxu1 %v1415_v25  ;;  %v1124_v25 = vld [vmem:[%s2011_s4] ss:$0 sm:$0xff] }
 0x18a   : > { %v554_v60 = vadd.f32 %v1223_v59, %v1907_v30  ;;  %v545_v61 = vpop.f32.mrb[9].mxu0  ;;  %1295 = vmatprep.subr.bf16.mxu1 %v1416_v26 }
 0x18b   : > { %v546_v62 = vadd.f32 %v1907_v30, %v545_v61  ;;  %v1224_v63 = vpop.f32.mrb[10].mxu0  ;;  %1249 = vmatprep.mubr.bf16.mxu1 %v594_v58 }
 0x18c   : > { %v557_v0 = vadd.f32 %v1224_v63, %v1907_v30  ;;  %v548_v1 = vpop.f32.mrb[11].mxu0  ;;  %1250 = vmatmul.mubr.bf16.gmra.mrb[4].mxu1 %v595_v57  ;;  %v586_v3 = vmax.f32 %v554_v60, 0.0 }
 0x18d   : > { %v549_v2 = vadd.f32 %v1907_v30, %v548_v1  ;;  %1303 = vmatpush3.bf16.msra.mxu1 %v1416_v26  ;;  %v584_v5 = vmax.f32 %v546_v62, 0.0 }
 0x18e   : > { %v587_v4 = vmax.f32 %v557_v0, 0.0  ;;  %1296 = vmatprep.subr.bf16.mxu1 %v1892_v27 }
 0x18f   : > { %v585_v6 = vmax.f32 %v549_v2, 0.0 }
 0x190   : > { %v597_v7 = vpack.c.bf16 %v587_v4, %v586_v3 }
 0x191   : > { %v596_v8 = vpack.c.bf16 %v585_v6, %v584_v5  ;;  %v1227_v9 = vpop.f32.mrb[12].mxu0  ;;  %1304 = vmatpush3.bf16.msra.mxu1 %v1892_v27 }
 0x192   : > { %v570_v10 = vadd.f32 %v1227_v9, %v1907_v30  ;;  %v561_v11 = vpop.f32.mrb[13].mxu0  ;;  %1297 = vmatprep.subr.bf16.mxu1 %v1895_v28 }
 0x193   : > { %v562_v12 = vadd.f32 %v1907_v30, %v561_v11  ;;  %v1228_v13 = vpop.f32.mrb[14].mxu0  ;;  %1253 = vmatprep.mubr.bf16.mxu1 %v596_v8 }
 0x194   : > { %v573_v14 = vadd.f32 %v1228_v13, %v1907_v30  ;;  %v564_v15 = vpop.f32.mrb[15].mxu0  ;;  %1254 = vmatmul.mubr.bf16.gmra.mrb[8].mxu1 %v597_v7  ;;  %v590_v17 = vmax.f32 %v570_v10, 0.0 }
 0x195   : > { %v565_v16 = vadd.f32 %v1907_v30, %v564_v15  ;;  %1305 = vmatpush3.bf16.msra.mxu1 %v1895_v28  ;;  %v588_v19 = vmax.f32 %v562_v12, 0.0 }
 0x196   : > { %v591_v18 = vmax.f32 %v573_v14, 0.0  ;;  %1298 = vmatprep.subr.bf16.mxu1 %v1899_v29 }
 0x197   : > { %v589_v20 = vmax.f32 %v565_v16, 0.0 }
 0x198   : > { %v599_v21 = vpack.c.bf16 %v591_v18, %v590_v17  ;;  %v1133_v18 = vld [vmem:[%s2013_s6] ss:$0 sm:$0xff] }
 0x199   : > { %v598_v22 = vpack.c.bf16 %v589_v20, %v588_v19  ;;  %1306 = vmatpush3.bf16.msra.mxu1 %v1899_v29 }
 0x19a   : > { %1299 = vmatprep.subr.bf16.mxu1 %v1420_v23 }
 0x19b   : > { %1257 = vmatprep.mubr.bf16.mxu1 %v598_v22 }
 0x19c   : > { %1258 = vmatmul.mubr.bf16.gmra.mrb[12].mxu1 %v599_v21 }
 0x19d   : > { %1307 = vmatpush3.bf16.msra.mxu1 %v1420_v23 }
 0x19e   : > { %1300 = vmatprep.subr.bf16.mxu1 %v1421_v24 }
 0x1a1   : > { %1308 = vmatpush3.bf16.msra.mxu1 %v1421_v24 }
 0x257   : > { %v1247_v26 = vpop.f32.mrb[0].mxu1 }
 0x258   : > { %v714_v27 = vadd.f32 %v1247_v26, %v1124_v25  ;;  %v705_v28 = vpop.f32.mrb[1].mxu1 }
 0x259   : > { %v706_v29 = vadd.f32 %v1124_v25, %v705_v28  ;;  %v1248_v30 = vpop.f32.mrb[2].mxu1 }
 0x25a   : > { %v717_v31 = vadd.f32 %v1248_v30, %v1124_v25  ;;  %v708_v32 = vpop.f32.mrb[3].mxu1  ;;  %v770_v34 = vmax.f32 %v714_v27, 0.0 }
 0x25b   : > { %v709_v33 = vadd.f32 %v1124_v25, %v708_v32  ;;  %v768_v36 = vmax.f32 %v706_v29, 0.0 }
 0x25c   : > { %v771_v35 = vmax.f32 %v717_v31, 0.0 }
 0x25d   : > { %v769_v37 = vmax.f32 %v709_v33, 0.0 }
 0x25e   : > { %v785_v38 = vpack.c.bf16 %v771_v35, %v770_v34 }
 0x25f   : > { %v784_v39 = vpack.c.bf16 %v769_v37, %v768_v36  ;;  %v1251_v40 = vpop.f32.mrb[4].mxu1 }
 0x260   : > { %v730_v41 = vadd.f32 %v1251_v40, %v1124_v25  ;;  %v721_v42 = vpop.f32.mrb[5].mxu1 }
 0x261   : > { %v722_v43 = vadd.f32 %v1124_v25, %v721_v42  ;;  %v1252_v44 = vpop.f32.mrb[6].mxu1  ;;  %1277 = vmatprep.mubr.bf16.mxu0 %v784_v39 }
 0x262   : > { %v733_v45 = vadd.f32 %v1252_v44, %v1124_v25  ;;  %v724_v46 = vpop.f32.mrb[7].mxu1  ;;  %1278 = vmatmul.mubr.bf16.vlgmr.msra.gmra.mrb[16].mxu0 %v785_v38  ;;  %v774_v48 = vmax.f32 %v730_v41, 0.0 }
 0x263   : > { %v725_v47 = vadd.f32 %v1124_v25, %v724_v46  ;;  %v772_v50 = vmax.f32 %v722_v43, 0.0 }
 0x264   : > { %v775_v49 = vmax.f32 %v733_v45, 0.0 }
 0x265   : > { %v773_v51 = vmax.f32 %v725_v47, 0.0 }
 0x266   : > { %v787_v52 = vpack.c.bf16 %v775_v49, %v774_v48 }
 0x267   : > { %v786_v53 = vpack.c.bf16 %v773_v51, %v772_v50  ;;  %v1255_v54 = vpop.f32.mrb[8].mxu1 }
 0x268   : > { %v746_v55 = vadd.f32 %v1255_v54, %v1124_v25  ;;  %v737_v56 = vpop.f32.mrb[9].mxu1 }
 0x269   : > { %v738_v57 = vadd.f32 %v1124_v25, %v737_v56  ;;  %v1256_v58 = vpop.f32.mrb[10].mxu1  ;;  %1281 = vmatprep.mubr.bf16.mxu0 %v786_v53 }
 0x26a   : > { %v749_v59 = vadd.f32 %v1256_v58, %v1124_v25  ;;  %v740_v60 = vpop.f32.mrb[11].mxu1  ;;  %1282 = vmatmul.mubr.bf16.gmra.mrb[20].mxu0 %v787_v52  ;;  %v778_v62 = vmax.f32 %v746_v55, 0.0 }
 0x26b   : > { %v741_v61 = vadd.f32 %v1124_v25, %v740_v60  ;;  %v776_v0 = vmax.f32 %v738_v57, 0.0 }
 0x26c   : > { %v779_v63 = vmax.f32 %v749_v59, 0.0 }
 0x26d   : > { %v777_v1 = vmax.f32 %v741_v61, 0.0 }
 0x26e   : > { %v789_v2 = vpack.c.bf16 %v779_v63, %v778_v62 }
 0x26f   : > { %v788_v3 = vpack.c.bf16 %v777_v1, %v776_v0  ;;  %v1259_v4 = vpop.f32.mrb[12].mxu1 }
 0x270   : > { %v762_v5 = vadd.f32 %v1259_v4, %v1124_v25  ;;  %v753_v6 = vpop.f32.mrb[13].mxu1 }
 0x271   : > { %v754_v7 = vadd.f32 %v1124_v25, %v753_v6  ;;  %v1260_v8 = vpop.f32.mrb[14].mxu1  ;;  %1285 = vmatprep.mubr.bf16.mxu1 %v788_v3 }
 0x272   : > { %v765_v9 = vadd.f32 %v1260_v8, %v1124_v25  ;;  %v756_v10 = vpop.f32.mrb[15].mxu1  ;;  %1286 = vmatmul.mubr.bf16.vlgmr.msra.gmra.mrb[16].mxu1 %v789_v2  ;;  %v782_v12 = vmax.f32 %v762_v5, 0.0 }
 0x273   : > { %v757_v11 = vadd.f32 %v1124_v25, %v756_v10  ;;  %v780_v14 = vmax.f32 %v754_v7, 0.0 }
 0x274   : > { %v783_v13 = vmax.f32 %v765_v9, 0.0 }
 0x275   : > { %v781_v15 = vmax.f32 %v757_v11, 0.0 }
 0x276   : > { %v791_v16 = vpack.c.bf16 %v783_v13, %v782_v12 }
 0x277   : > { %v790_v17 = vpack.c.bf16 %v781_v15, %v780_v14 }
 0x279   : > { %1289 = vmatprep.mubr.bf16.mxu1 %v790_v17 }
 0x27a   : > { %1290 = vmatmul.mubr.bf16.gmra.mrb[20].mxu1 %v791_v16 }
 0x335   : > { %v1279_v19 = vpop.f32.mrb[16].mxu0 }
 0x336   : > { %v906_v20 = vadd.f32 %v1279_v19, %v1133_v18  ;;  %v897_v21 = vpop.f32.mrb[17].mxu0 }
 0x337   : > { %v898_v22 = vadd.f32 %v1133_v18, %v897_v21  ;;  %v1280_v23 = vpop.f32.mrb[18].mxu0 }
 0x338   : > { %962 = vst [vmem:[%s1938_s12 + $0x10] sm:$0xff] %v906_v20  ;;  %v909_v24 = vadd.f32 %v1280_v23, %v1133_v18  ;;  %v900_v25 = vpop.f32.mrb[19].mxu0 }
 0x339   : > { %960 = vst [vmem:[%s1938_s12] sm:$0xff] %v898_v22  ;;  %v901_v26 = vadd.f32 %v1133_v18, %v900_v25 }
 0x33a   : > { %963 = vst [vmem:[%s1938_s12 + $0x18] sm:$0xff] %v909_v24 }
 0x33b   : > { %961 = vst [vmem:[%s1938_s12 + $0x8] sm:$0xff] %v901_v26 }
 0x33d   : > { %v1283_v27 = vpop.f32.mrb[20].mxu0 }
 0x33e   : > { %v922_v28 = vadd.f32 %v1283_v27, %v1133_v18  ;;  %v913_v29 = vpop.f32.mrb[21].mxu0 }
 0x33f   : > { %v914_v30 = vadd.f32 %v1133_v18, %v913_v29  ;;  %v1284_v31 = vpop.f32.mrb[22].mxu0 }
 0x340   : > { %966 = vst [vmem:[%s1938_s12 + $0x30] sm:$0xff] %v922_v28  ;;  %v925_v32 = vadd.f32 %v1284_v31, %v1133_v18  ;;  %v916_v33 = vpop.f32.mrb[23].mxu0 }
 0x341   : > { %964 = vst [vmem:[%s1938_s12 + $0x20] sm:$0xff] %v914_v30  ;;  %v917_v34 = vadd.f32 %v1133_v18, %v916_v33 }
 0x342   : > { %967 = vst [vmem:[%s1938_s12 + $0x38] sm:$0xff] %v925_v32 }
 0x343   : > { %965 = vst [vmem:[%s1938_s12 + $0x28] sm:$0xff] %v917_v34 }
 0x345   : > { %v1287_v35 = vpop.f32.mrb[16].mxu1 }
 0x346   : > { %v938_v36 = vadd.f32 %v1287_v35, %v1133_v18  ;;  %v929_v37 = vpop.f32.mrb[17].mxu1 }
 0x347   : > { %v930_v38 = vadd.f32 %v1133_v18, %v929_v37  ;;  %v1288_v39 = vpop.f32.mrb[18].mxu1 }
 0x348   : > { %970 = vst [vmem:[%s1938_s12 + $0x50] sm:$0xff] %v938_v36  ;;  %v941_v40 = vadd.f32 %v1288_v39, %v1133_v18  ;;  %v932_v41 = vpop.f32.mrb[19].mxu1 }
 0x349   : > { %968 = vst [vmem:[%s1938_s12 + $0x40] sm:$0xff] %v930_v38  ;;  %v933_v42 = vadd.f32 %v1133_v18, %v932_v41 }
 0x34a   : > { %971 = vst [vmem:[%s1938_s12 + $0x58] sm:$0xff] %v941_v40 }
 0x34b   : > { %969 = vst [vmem:[%s1938_s12 + $0x48] sm:$0xff] %v933_v42 }
 0x34d   : > { %v1291_v43 = vpop.f32.mrb[20].mxu1 }
 0x34e   : > { %v954_v44 = vadd.f32 %v1291_v43, %v1133_v18  ;;  %v945_v45 = vpop.f32.mrb[21].mxu1 }
 0x34f   : > { %v946_v46 = vadd.f32 %v1133_v18, %v945_v45  ;;  %v1292_v47 = vpop.f32.mrb[22].mxu1 }
 0x350   : > { %974 = vst [vmem:[%s1938_s12 + $0x70] sm:$0xff] %v954_v44  ;;  %v957_v48 = vadd.f32 %v1292_v47, %v1133_v18  ;;  %v948_v49 = vpop.f32.mrb[23].mxu1 }
 0x351   : > { %972 = vst [vmem:[%s1938_s12 + $0x60] sm:$0xff] %v946_v46  ;;  %v949_v50 = vadd.f32 %v1133_v18, %v948_v49 }
 0x352   : > { %975 = vst [vmem:[%s1938_s12 + $0x78] sm:$0xff] %v957_v48 }
 0x353   : > { %973 = vst [vmem:[%s1938_s12 + $0x68] sm:$0xff] %v949_v50 }
 0x354   : > { %1549 = shalt.err (!%p1546_p4)
}
 0x355   : > { %s1550_s15 = scalar_lea.hbm %s1958_s11, 2048  ;;  %s1554_s8 = scalar_lea.hbm %s2014_s7, 4096 }
 0x356   : > { %p1551_p9 = scmp.ne.s32.totalorder %s1958_s11, %s1550_s15  ;;  %p1555_p8 = scmp.lt.u32.totalorder %s1958_s11, %s2014_s7 }
 0x357   : > { %p1556_p13 = scmp.lt.u32.totalorder %s1554_s8, %s1550_s15  ;;  %p1558_p10 = scmp.lt.u32.totalorder %s1550_s15, %s1958_s11 }
 0x358   : > { %p1552_p0 = pnand %p1551_p9, %p1815_p5 }
 0x359   : > { %p1557_p6 = por %p1556_p13, %p1555_p8 }
 0x35a   : > { %p1553_p11 = pneg %p1552_p0 }
 0x35b   : > { %p1559_p3 = por %p1558_p10, %p1557_p6 }
 0x35d   : > { %p1560_p7 = pnand %p1559_p3, %p1553_p11 }
 0x35f   : > { %1563 = shalt.err (!%p1560_p7)
}
 0x360   : > { %s1619_s29 = smov 128   ;;  %s1620_s23 = smov 8  }
 0x361   : > { %1323 = dma.vmem_to_hbm [thread:$0]  (%p1815_p5), %s1960_s16, 2048, %s1958_s11, %s977_s28, %s1619_s29, %s1619_s29, %s1620_s23  }
 0x362 PF: > { %s2034_s20 = sld [smem:[#allocation15_spill]]  ;;  %s1005_s30 = sand.u32 1, %s1598_s24  }
 0x363   : > { %p2036_p1 = scmp.ge.s32.totalorder %s1610_s27, 2  ;;  %s1006_s9 = scalar_lea.sflag [#allocation4], %s1005_s30 }
 0x368   : > { %p2035_p12 = scmp.ne.s32.totalorder %s2034_s20, 0 }
 0x36a   : > { %p1340_p2 = pnand %p2036_p1, %p2035_p12 }
 0x36c   : > { %1593 = dma.done.wait (!%p1340_p2), %s1006_s9, 2048  }
 0x36d   : > { %1595 = vsyncadd (!%p1340_p2), %s1006_s9, 4294965248  ;;  %p22_p4 = scmp.ge.s32.totalorder %s1801_s22, 4   ;;  %s2037_s24 = smov %s1602_s25 }
 0x36e   : > { %s2038_s25 = smov %s1606_s26  ;;  %s2039_s26 = smov %s1811_s18 }
 0x36f   : > { %s2040_s27 = smov %s1801_s22  ;;  %24 = sbr.rel (!%p22_p4) target bundleno = 7 (0x7), region = 105 }
 0x376   :  { %1011 = vsyncpa [#allocation3], 1 }
 0x377   :  { %1013 = vsyncpa [#allocation3 + $0x1], 1 }
 0x378   :  { %1014 = vsyncpa [#allocation6], 1 }
 0x379   :  { %1015 = vsyncpa [#allocation9], 1 }
 0x37a   :  { %1016 = vsyncpa [#allocation4], 1 }
 0x37b   :  { %1018 = vsyncpa [#allocation4 + $0x1], 1 }

</bundles_post_ra>
